<compile_context>
chip_gen: v7x
topology: tpu7x:2x2x1
jax: 0.10.0
libtpu: 0.0.40
codegen_flags: <defaults>
</compile_context>

<pallas_src>
import functools

import jax
import jax.numpy as jnp
from jax.experimental import pallas as pl
from jax.experimental.pallas import tpu as pltpu

_LANE = 128               # lane width (last-dim alignment)
_SUBLANE = 8              # sublane width (second-to-last dim alignment)
_MAX_TILE_M = 8192        # diminishing returns beyond this (per tile sweep)
_SPLIT_THRESHOLD = 512    # split batch into >=2 tiles above this many rows


def _round_up(x, m):
    return (x + m - 1) // m * m


def _vmem_capacity_bytes():
    """Per-core VMEM capacity; conservative v7x (64 MiB) fallback."""
    try:
        return int(pltpu.get_tpu_info().vmem_capacity_bytes)
    except Exception:
        return 64 * 1024 * 1024


def _fused_mlp_kernel(*refs, n_layers: int):
    """refs = (x_ref, w1, b1, ..., wL, bL, o_ref).

    Chains all layers on one M-tile; intermediates live in vregs/VMEM only.
    """
    x_ref = refs[0]
    o_ref = refs[-1]
    h = x_ref[...]
    for i in range(n_layers):
        w_ref = refs[1 + 2 * i]
        b_ref = refs[2 + 2 * i]
        lhs = h.astype(w_ref.dtype)        # bf16 MXU path when weights are bf16
        h = jnp.dot(lhs, w_ref[...], preferred_element_type=jnp.float32)
        h = h + b_ref[...].astype(jnp.float32)   # bias add in f32 (VPU)
        if i < n_layers - 1:
            h = jnp.maximum(h, 0.0)              # ReLU on hidden layers only
    o_ref[...] = h.astype(o_ref.dtype)


def prepare_emotion_classifier_params(params, matmul_dtype=jnp.float32):
    """Pad parameters ONCE (do this outside the per-call / jitted path).

    Layer 0 keeps the true input_dim contraction (x is fed unpadded); hidden
    and output dims are zero-padded to multiples of 128 (exact through ReLU).
    Pass matmul_dtype=jnp.bfloat16 on v6e/v7x at real sizes.
    """
    padded = []
    for i, (w, b) in enumerate(params):
        k_in, n_out = w.shape
        kp = k_in if i == 0 else _round_up(k_in, _LANE)
        np_ = _round_up(n_out, _LANE)
        w_p = jnp.zeros((kp, np_), matmul_dtype).at[:k_in, :n_out].set(
            w.astype(matmul_dtype))
        b_p = jnp.zeros((1, np_), jnp.float32).at[0, :n_out].set(
            b.astype(jnp.float32))
        padded.append((w_p, b_p))
    return padded


def emotion_classifier_forward(padded_params, x, out_dim,
                               single_buffer_params=True):
    """Fused MLP forward.  padded_params from prepare_emotion_classifier_params;
    x: [M, input_dim] (unpadded); out_dim: true output width (static)."""
    M, K = x.shape
    n_layers = len(padded_params)
    n_pads = [w.shape[1] for (w, _) in padded_params]
    n_pad = n_pads[-1]

    # --- VMEM-budget-driven tile_m (exact accounting, generation-aware) ------
    vmem_budget = int(0.75 * _vmem_capacity_bytes())   # ~48 MiB v7x, ~96 MiB v5e/v6e
    param_buf_factor = 1 if single_buffer_params else 2
    param_bytes = sum(w.size * w.dtype.itemsize + b.size * b.dtype.itemsize
                      for (w, b) in padded_params)
    widths = [K] + n_pads
    per_row = (2 * K * x.dtype.itemsize     # x block, double-buffered
               + 2 * n_pad * 4              # f32 out block, double-buffered
               + 2 * max(widths) * 4)       # TWO live f32 intermediates per layer
    slack = 2 * 1024 * 1024                 # compiler scratch headroom
    avail = max(vmem_budget - param_buf_factor * param_bytes - slack,
                per_row * _SUBLANE)
    tile_cap = max(_SUBLANE,
                   min(_MAX_TILE_M, (avail // per_row) // _SUBLANE * _SUBLANE))

    m_aligned = _round_up(M, _SUBLANE)
    tile_m = min(tile_cap, m_aligned)
    if m_aligned >= 2 * _SPLIT_THRESHOLD:
        # Ensure grid_m >= 2 so ("parallel",) gives the second TC (v7x) work.
        tile_m = min(tile_m, _round_up(pl.cdiv(m_aligned, 2), _SUBLANE))
    tile_m = max(tile_m, _SUBLANE)
    grid_m = pl.cdiv(M, tile_m)             # ragged last tile: OOB writes dropped

    # --- Specs / operands -----------------------------------------------------
    param_spec_kwargs = (
        {"pipeline_mode": pl.Buffered(1)} if single_buffer_params else {})
    operands = [x]
    in_specs = [pl.BlockSpec((tile_m, K), lambda i: (i, 0))]
    for (w_p, b_p) in padded_params:
        kp, np_ = w_p.shape
        operands += [w_p, b_p]
        # Constant index maps -> resident across the M grid; single-buffered
        # (params never change), halving resident-param VMEM.
        in_specs += [
            pl.BlockSpec((kp, np_), lambda i: (0, 0), **param_spec_kwargs),
            pl.BlockSpec((1, np_), lambda i: (0, 0), **param_spec_kwargs),
        ]

    out_shape = jax.ShapeDtypeStruct((M, n_pad), jnp.float32)
    out_spec = pl.BlockSpec((tile_m, n_pad), lambda i: (i, 0))

    flops = 2 * M * sum(w.shape[0] * w.shape[1] for (w, _) in padded_params)
    bytes_accessed = (M * K * x.dtype.itemsize + M * n_pad * 4 + param_bytes)
    cost = pl.CostEstimate(flops=flops, transcendentals=0,
                           bytes_accessed=bytes_accessed)

    kernel = functools.partial(_fused_mlp_kernel, n_layers=n_layers)
    out_p = pl.pallas_call(
        kernel,
        out_shape=out_shape,
        grid=(grid_m,),
        in_specs=in_specs,
        out_specs=out_spec,
        compiler_params=pltpu.CompilerParams(
            dimension_semantics=("parallel",),   # shard batch tiles across TCs
            vmem_limit_bytes=vmem_budget,
        ),
        cost_estimate=cost,
    )(*operands)

    # Slice the lane-padded output back to the logical width (M is unpadded).
    return out_p[:, :out_dim]


def init_emotion_classifier_params(key, input_dim, hidden_dims, output_dim):
    """Deterministic synthetic params matching nn.Linear shapes, stored [in, out]."""
    dims = [input_dim] + list(hidden_dims) + [output_dim]
    params = []
    for i in range(len(dims) - 1):
        key, kw, kb = jax.random.split(key, 3)
        bound = 1.0 / jnp.sqrt(dims[i])
        w = jax.random.uniform(kw, (dims[i], dims[i + 1]),
                               minval=-bound, maxval=bound, dtype=jnp.float32)
        b = jax.random.uniform(kb, (dims[i + 1],),
                               minval=-bound, maxval=bound, dtype=jnp.float32)
        params.append((w, b))
    return params


if __name__ == "__main__":
    # Small shapes consistent with the module: x is [batch, input_dim].
    batch = 8
    input_dim = 32
    hidden_dims = [64, 32]
    output_dim = 8

    key = jax.random.PRNGKey(0)
    key, kx = jax.random.split(key)
    x = jax.random.normal(kx, (batch, input_dim), dtype=jnp.float32)
    params = init_emotion_classifier_params(key, input_dim, hidden_dims, output_dim)

    # Pad params ONCE, outside the jitted per-call path.  f32 MXU keeps the
    # toy-shape check exact; use jnp.bfloat16 on v6e/v7x at real hidden sizes.
    padded_params = prepare_emotion_classifier_params(params,
                                                      matmul_dtype=jnp.float32)

    forward = jax.jit(emotion_classifier_forward, static_argnums=(2, 3))
    try:
        out = jax.block_until_ready(forward(padded_params, x, output_dim, True))
    except Exception:
        # Fallback if this JAX build rejects single-buffered (Buffered(1))
        # constant blocks — default double-buffering is still correct.
        out = jax.block_until_ready(forward(padded_params, x, output_dim, False))

    # Pure-JAX reference.
    ref = x
    for i, (w, b) in enumerate(params):
        ref = ref @ w + b
        if i < len(params) - 1:
            ref = jnp.maximum(ref, 0.0)

    assert out.shape == (batch, output_dim)
    assert jnp.allclose(out, ref, atol=1e-5, rtol=1e-5)

    print("KERNEL_OK")
</pallas_src>

<mosaic_0001>
module attributes {stable_mosaic.version = 11 : i64} {
  func.func @_fused_mlp_kernel(%arg0: i32, %arg1: memref<8x32xf32, #tpu.memory_space<vmem>>, %arg2: memref<32x128xf32, #tpu.memory_space<vmem>>, %arg3: memref<1x128xf32, #tpu.memory_space<vmem>>, %arg4: memref<128x128xf32, #tpu.memory_space<vmem>>, %arg5: memref<1x128xf32, #tpu.memory_space<vmem>>, %arg6: memref<128x128xf32, #tpu.memory_space<vmem>>, %arg7: memref<1x128xf32, #tpu.memory_space<vmem>>, %arg8: memref<8x128xf32, #tpu.memory_space<vmem>>) attributes {dimension_semantics = [#tpu.dimension_semantics<parallel>], iteration_bounds = array<i64: 1>, scalar_prefetch = 0 : i64, scratch_operands = 0 : i64, tpu.core_type = #tpu.core_type<tc>, window_params = [{transform_indices = @transform_0, window_bounds = array<i64: 8, 32>}, {pipeline_mode = #tpu.pipeline_mode<synchronous>, transform_indices = @transform_1, window_bounds = array<i64: 32, 128>}, {pipeline_mode = #tpu.pipeline_mode<synchronous>, transform_indices = @transform_2, window_bounds = array<i64: 1, 128>}, {pipeline_mode = #tpu.pipeline_mode<synchronous>, transform_indices = @transform_3, window_bounds = array<i64: 128, 128>}, {pipeline_mode = #tpu.pipeline_mode<synchronous>, transform_indices = @transform_4, window_bounds = array<i64: 1, 128>}, {pipeline_mode = #tpu.pipeline_mode<synchronous>, transform_indices = @transform_5, window_bounds = array<i64: 128, 128>}, {pipeline_mode = #tpu.pipeline_mode<synchronous>, transform_indices = @transform_6, window_bounds = array<i64: 1, 128>}, {transform_indices = @transform_7, window_bounds = array<i64: 8, 128>}]} {
    %c0 = arith.constant 0 : index
    %c0_0 = arith.constant 0 : index
    %0 = vector.load %arg1[%c0, %c0_0] : memref<8x32xf32, #tpu.memory_space<vmem>>, vector<8x32xf32>
    %c0_1 = arith.constant 0 : index
    %c0_2 = arith.constant 0 : index
    %1 = vector.load %arg2[%c0_1, %c0_2] : memref<32x128xf32, #tpu.memory_space<vmem>>, vector<32x128xf32>
    %cst = arith.constant dense<0.000000e+00> : vector<8x128xf32>
    %2 = tpu.matmul %0, %1, %cst {dimension_numbers = #tpu.dot_dimension_numbers<[1], [0], [0], [1], [0, 0, 1, 1], [], []>} : vector<8x32xf32>, vector<32x128xf32>, vector<8x128xf32> -> vector<8x128xf32>
    %c0_3 = arith.constant 0 : index
    %c0_4 = arith.constant 0 : index
    %3 = vector.load %arg3[%c0_3, %c0_4] : memref<1x128xf32, #tpu.memory_space<vmem>>, vector<1x128xf32>
    %4 = vector.broadcast %3 : vector<1x128xf32> to vector<8x128xf32>
    %5 = arith.addf %2, %4 : vector<8x128xf32>
    %cst_5 = arith.constant 0.000000e+00 : f32
    %6 = vector.broadcast %cst_5 : f32 to vector<8x128xf32>
    %7 = arith.maximumf %5, %6 : vector<8x128xf32>
    %c0_6 = arith.constant 0 : index
    %c0_7 = arith.constant 0 : index
    %8 = vector.load %arg4[%c0_6, %c0_7] : memref<128x128xf32, #tpu.memory_space<vmem>>, vector<128x128xf32>
    %cst_8 = arith.constant dense<0.000000e+00> : vector<8x128xf32>
    %9 = tpu.matmul %7, %8, %cst_8 {dimension_numbers = #tpu.dot_dimension_numbers<[1], [0], [0], [1], [0, 0, 1, 1], [], []>} : vector<8x128xf32>, vector<128x128xf32>, vector<8x128xf32> -> vector<8x128xf32>
    %c0_9 = arith.constant 0 : index
    %c0_10 = arith.constant 0 : index
    %10 = vector.load %arg5[%c0_9, %c0_10] : memref<1x128xf32, #tpu.memory_space<vmem>>, vector<1x128xf32>
    %11 = vector.broadcast %10 : vector<1x128xf32> to vector<8x128xf32>
    %12 = arith.addf %9, %11 : vector<8x128xf32>
    %cst_11 = arith.constant 0.000000e+00 : f32
    %13 = vector.broadcast %cst_11 : f32 to vector<8x128xf32>
    %14 = arith.maximumf %12, %13 : vector<8x128xf32>
    %c0_12 = arith.constant 0 : index
    %c0_13 = arith.constant 0 : index
    %15 = vector.load %arg6[%c0_12, %c0_13] : memref<128x128xf32, #tpu.memory_space<vmem>>, vector<128x128xf32>
    %cst_14 = arith.constant dense<0.000000e+00> : vector<8x128xf32>
    %16 = tpu.matmul %14, %15, %cst_14 {dimension_numbers = #tpu.dot_dimension_numbers<[1], [0], [0], [1], [0, 0, 1, 1], [], []>} : vector<8x128xf32>, vector<128x128xf32>, vector<8x128xf32> -> vector<8x128xf32>
    %c0_15 = arith.constant 0 : index
    %c0_16 = arith.constant 0 : index
    %17 = vector.load %arg7[%c0_15, %c0_16] : memref<1x128xf32, #tpu.memory_space<vmem>>, vector<1x128xf32>
    %18 = vector.broadcast %17 : vector<1x128xf32> to vector<8x128xf32>
    %19 = arith.addf %16, %18 : vector<8x128xf32>
    %c0_17 = arith.constant 0 : index
    %c0_18 = arith.constant 0 : index
    %20 = vector.load %arg8[%c0_17, %c0_18] : memref<8x128xf32, #tpu.memory_space<vmem>>, vector<8x128xf32>
    tpu.vector_store %arg8[%c0_17, %c0_18], %19 {strides = array<i32>} : memref<8x128xf32, #tpu.memory_space<vmem>>, vector<8x128xf32>,
    return
  }
  func.func @transform_0(%arg0: i32) -> (i32, i32) {
    %c0_i32 = arith.constant 0 : i32
    %c0_i32_0 = arith.constant 0 : i32
    return %arg0, %c0_i32 : i32, i32
  }
  func.func @transform_1(%arg0: i32) -> (i32, i32) {
    %c0_i32 = arith.constant 0 : i32
    %c0_i32_0 = arith.constant 0 : i32
    %c0_i32_1 = arith.constant 0 : i32
    return %c0_i32, %c0_i32_0 : i32, i32
  }
  func.func @transform_2(%arg0: i32) -> (i32, i32) {
    %c0_i32 = arith.constant 0 : i32
    %c0_i32_0 = arith.constant 0 : i32
    %c0_i32_1 = arith.constant 0 : i32
    return %c0_i32, %c0_i32_0 : i32, i32
  }
  func.func @transform_3(%arg0: i32) -> (i32, i32) {
    %c0_i32 = arith.constant 0 : i32
    %c0_i32_0 = arith.constant 0 : i32
    %c0_i32_1 = arith.constant 0 : i32
    return %c0_i32, %c0_i32_0 : i32, i32
  }
  func.func @transform_4(%arg0: i32) -> (i32, i32) {
    %c0_i32 = arith.constant 0 : i32
    %c0_i32_0 = arith.constant 0 : i32
    %c0_i32_1 = arith.constant 0 : i32
    return %c0_i32, %c0_i32_0 : i32, i32
  }
  func.func @transform_5(%arg0: i32) -> (i32, i32) {
    %c0_i32 = arith.constant 0 : i32
    %c0_i32_0 = arith.constant 0 : i32
    %c0_i32_1 = arith.constant 0 : i32
    return %c0_i32, %c0_i32_0 : i32, i32
  }
  func.func @transform_6(%arg0: i32) -> (i32, i32) {
    %c0_i32 = arith.constant 0 : i32
    %c0_i32_0 = arith.constant 0 : i32
    %c0_i32_1 = arith.constant 0 : i32
    return %c0_i32, %c0_i32_0 : i32, i32
  }
  func.func @transform_7(%arg0: i32) -> (i32, i32) {
    %c0_i32 = arith.constant 0 : i32
    %c0_i32_0 = arith.constant 0 : i32
    return %arg0, %c0_i32 : i32, i32
  }
}

module attributes {stable_mosaic.version = 11 : i64} {
  func.func @_fused_mlp_kernel(%arg0: i32, %arg1: memref<8x32xf32, #tpu.memory_space<vmem>>, %arg2: memref<32x128xf32, #tpu.memory_space<vmem>>, %arg3: memref<1x128xf32, #tpu.memory_space<vmem>>, %arg4: memref<128x128xf32, #tpu.memory_space<vmem>>, %arg5: memref<1x128xf32, #tpu.memory_space<vmem>>, %arg6: memref<128x128xf32, #tpu.memory_space<vmem>>, %arg7: memref<1x128xf32, #tpu.memory_space<vmem>>, %arg8: memref<8x128xf32, #tpu.memory_space<vmem>>) attributes {dimension_semantics = [#tpu.dimension_semantics<parallel>], iteration_bounds = array<i64: 1>, scalar_prefetch = 0 : i64, scratch_operands = 0 : i64, tpu.core_type = #tpu.core_type<tc>, window_params = [{transform_indices = @transform_0, window_bounds = array<i64: 8, 32>}, {pipeline_mode = #tpu.pipeline_mode<synchronous>, transform_indices = @transform_1, window_bounds = array<i64: 32, 128>}, {pipeline_mode = #tpu.pipeline_mode<synchronous>, transform_indices = @transform_2, window_bounds = array<i64: 1, 128>}, {pipeline_mode = #tpu.pipeline_mode<synchronous>, transform_indices = @transform_3, window_bounds = array<i64: 128, 128>}, {pipeline_mode = #tpu.pipeline_mode<synchronous>, transform_indices = @transform_4, window_bounds = array<i64: 1, 128>}, {pipeline_mode = #tpu.pipeline_mode<synchronous>, transform_indices = @transform_5, window_bounds = array<i64: 128, 128>}, {pipeline_mode = #tpu.pipeline_mode<synchronous>, transform_indices = @transform_6, window_bounds = array<i64: 1, 128>}, {transform_indices = @transform_7, window_bounds = array<i64: 8, 128>}]} {
    %c0 = arith.constant 0 : index
    %c0_0 = arith.constant 0 : index
    %0 = vector.load %arg1[%c0, %c0_0] : memref<8x32xf32, #tpu.memory_space<vmem>>, vector<8x32xf32>
    %c0_1 = arith.constant 0 : index
    %c0_2 = arith.constant 0 : index
    %1 = vector.load %arg2[%c0_1, %c0_2] : memref<32x128xf32, #tpu.memory_space<vmem>>, vector<32x128xf32>
    %cst = arith.constant dense<0.000000e+00> : vector<8x128xf32>
    %2 = tpu.matmul %0, %1, %cst {dimension_numbers = #tpu.dot_dimension_numbers<[1], [0], [0], [1], [0, 0, 1, 1], [], []>} : vector<8x32xf32>, vector<32x128xf32>, vector<8x128xf32> -> vector<8x128xf32>
    %c0_3 = arith.constant 0 : index
    %c0_4 = arith.constant 0 : index
    %3 = vector.load %arg3[%c0_3, %c0_4] : memref<1x128xf32, #tpu.memory_space<vmem>>, vector<1x128xf32>
    %4 = vector.broadcast %3 : vector<1x128xf32> to vector<8x128xf32>
    %5 = arith.addf %2, %4 : vector<8x128xf32>
    %cst_5 = arith.constant 0.000000e+00 : f32
    %6 = vector.broadcast %cst_5 : f32 to vector<8x128xf32>
    %7 = arith.maximumf %5, %6 : vector<8x128xf32>
    %c0_6 = arith.constant 0 : index
    %c0_7 = arith.constant 0 : index
    %8 = vector.load %arg4[%c0_6, %c0_7] : memref<128x128xf32, #tpu.memory_space<vmem>>, vector<128x128xf32>
    %cst_8 = arith.constant dense<0.000000e+00> : vector<8x128xf32>
    %9 = tpu.matmul %7, %8, %cst_8 {dimension_numbers = #tpu.dot_dimension_numbers<[1], [0], [0], [1], [0, 0, 1, 1], [], []>} : vector<8x128xf32>, vector<128x128xf32>, vector<8x128xf32> -> vector<8x128xf32>
    %c0_9 = arith.constant 0 : index
    %c0_10 = arith.constant 0 : index
    %10 = vector.load %arg5[%c0_9, %c0_10] : memref<1x128xf32, #tpu.memory_space<vmem>>, vector<1x128xf32>
    %11 = vector.broadcast %10 : vector<1x128xf32> to vector<8x128xf32>
    %12 = arith.addf %9, %11 : vector<8x128xf32>
    %cst_11 = arith.constant 0.000000e+00 : f32
    %13 = vector.broadcast %cst_11 : f32 to vector<8x128xf32>
    %14 = arith.maximumf %12, %13 : vector<8x128xf32>
    %c0_12 = arith.constant 0 : index
    %c0_13 = arith.constant 0 : index
    %15 = vector.load %arg6[%c0_12, %c0_13] : memref<128x128xf32, #tpu.memory_space<vmem>>, vector<128x128xf32>
    %cst_14 = arith.constant dense<0.000000e+00> : vector<8x128xf32>
    %16 = tpu.matmul %14, %15, %cst_14 {dimension_numbers = #tpu.dot_dimension_numbers<[1], [0], [0], [1], [0, 0, 1, 1], [], []>} : vector<8x128xf32>, vector<128x128xf32>, vector<8x128xf32> -> vector<8x128xf32>
    %c0_15 = arith.constant 0 : index
    %c0_16 = arith.constant 0 : index
    %17 = vector.load %arg7[%c0_15, %c0_16] : memref<1x128xf32, #tpu.memory_space<vmem>>, vector<1x128xf32>
    %18 = vector.broadcast %17 : vector<1x128xf32> to vector<8x128xf32>
    %19 = arith.addf %16, %18 : vector<8x128xf32>
    %c0_17 = arith.constant 0 : index
    %c0_18 = arith.constant 0 : index
    %20 = vector.load %arg8[%c0_17, %c0_18] : memref<8x128xf32, #tpu.memory_space<vmem>>, vector<8x128xf32>
    tpu.vector_store %arg8[%c0_17, %c0_18], %19 {strides = array<i32>} : memref<8x128xf32, #tpu.memory_space<vmem>>, vector<8x128xf32>,
    return
  }
  func.func @transform_0(%arg0: i32) -> (i32, i32) {
    %c0_i32 = arith.constant 0 : i32
    %c0_i32_0 = arith.constant 0 : i32
    return %arg0, %c0_i32 : i32, i32
  }
  func.func @transform_1(%arg0: i32) -> (i32, i32) {
    %c0_i32 = arith.constant 0 : i32
    %c0_i32_0 = arith.constant 0 : i32
    %c0_i32_1 = arith.constant 0 : i32
    return %c0_i32, %c0_i32_0 : i32, i32
  }
  func.func @transform_2(%arg0: i32) -> (i32, i32) {
    %c0_i32 = arith.constant 0 : i32
    %c0_i32_0 = arith.constant 0 : i32
    %c0_i32_1 = arith.constant 0 : i32
    return %c0_i32, %c0_i32_0 : i32, i32
  }
  func.func @transform_3(%arg0: i32) -> (i32, i32) {
    %c0_i32 = arith.constant 0 : i32
    %c0_i32_0 = arith.constant 0 : i32
    %c0_i32_1 = arith.constant 0 : i32
    return %c0_i32, %c0_i32_0 : i32, i32
  }
  func.func @transform_4(%arg0: i32) -> (i32, i32) {
    %c0_i32 = arith.constant 0 : i32
    %c0_i32_0 = arith.constant 0 : i32
    %c0_i32_1 = arith.constant 0 : i32
    return %c0_i32, %c0_i32_0 : i32, i32
  }
  func.func @transform_5(%arg0: i32) -> (i32, i32) {
    %c0_i32 = arith.constant 0 : i32
    %c0_i32_0 = arith.constant 0 : i32
    %c0_i32_1 = arith.constant 0 : i32
    return %c0_i32, %c0_i32_0 : i32, i32
  }
  func.func @transform_6(%arg0: i32) -> (i32, i32) {
    %c0_i32 = arith.constant 0 : i32
    %c0_i32_0 = arith.constant 0 : i32
    %c0_i32_1 = arith.constant 0 : i32
    return %c0_i32, %c0_i32_0 : i32, i32
  }
  func.func @transform_7(%arg0: i32) -> (i32, i32) {
    %c0_i32 = arith.constant 0 : i32
    %c0_i32_0 = arith.constant 0 : i32
    return %arg0, %c0_i32 : i32, i32
  }
}

</mosaic_0001>

<bundles_post_ra>
// kernel: emotion_classifier_forward.1
= control target key start
LH: loop header
LB: loop body
LE: loop exit
PB: predicated region body
PF: predicated region fallthrough
CT: control target
= control target key end

     0   :  { %12 = vsyncpa [#allocation3], 0  ;;  %s786_s0 = inlined_call_operand.vmem [shape: f32[8,32], index: 0, kind: input, shape index: {}]   ;;  %s787_s1 = inlined_call_operand.hbm [shape: f32[32,128], index: 1, kind: input, shape index: {}]   ;;  %s788_s2 = inlined_call_operand.vmem [shape: f32[1,128], index: 2, kind: input, shape index: {}]   ;;  %s789_s3 = inlined_call_operand.hbm [shape: f32[128,128], index: 3, kind: input, shape index: {}]   ;;  %s790_s4 = inlined_call_operand.vmem [shape: f32[1,128], index: 4, kind: input, shape index: {}]   ;;  %s791_s5 = inlined_call_operand.hbm [shape: f32[128,128], index: 5, kind: input, shape index: {}]   ;;  %s792_s6 = inlined_call_operand.vmem [shape: f32[1,128], index: 6, kind: input, shape index: {}]   ;;  %s793_s7 = inlined_call_operand.hbm [shape: f32[8,128], index: 7, kind: output, shape index: {}]  }
   0x1   :  { %13 = vsyncpa [#allocation6], 0 }
   0x2   :  { %14 = vsyncpa [#allocation4], 0  ;;  %s640_s24 = smov [#allocation5]   ;;  %s641_s26 = smov [#allocation2]  }
   0x3   :  { %s36_s25 = sshll.u32 %s640_s24, 4  ;;  %s22_s27 = sshll.u32 %s641_s26, 4  ;;  %s37_s25 = int_to_ptr.vmem [resolvable:$true] %s36_s25  ;;  %s689_s27 = int_to_ptr.vmem [resolvable:$true] %s22_s27 }
   0x4   :  { %s546_s30 = scalar_lea.hbm %s789_s3, 2048 }
   0x5   :  { %p547_p0 = scmp.ne.s32.totalorder %s789_s3, %s546_s30  ;;  %p550_p1 = scmp.lt.u32.totalorder %s546_s30, %s789_s3 }
   0x7   :  { %p552_p2 = pnand %p550_p1, %p547_p0 }
   0x9   :  { %555 = shalt.err (!%p552_p2)
}
   0xa   :  { %s556_s12 = scalar_lea.vmem %s37_s25, 2048  ;;  %p561_p4 = scmp.lt.s32.totalorder %s37_s25, %s37_s25 }
   0xb   :  { %p557_p3 = scmp.ne.s32.totalorder %s37_s25, %s556_s12  ;;  %p562_p5 = scmp.lt.s32.totalorder %s556_s12, %s556_s12 }
   0xd   :  { %p563_p6 = por %p562_p5, %p561_p4 }
   0xf   :  { %p564_p7 = pnand %p563_p6, %p557_p3 }
  0x11   :  { %567 = shalt.err (!%p564_p7)
}
  0x12   :  { %s642_s13 = smov 128   ;;  %s643_s14 = smov 8  }
  0x13   :  { %42 = dma.hbm_to_vmem [thread:$0]  %s789_s3, 2048, %s37_s25, [#allocation6], %s642_s13, %s642_s13, %s643_s14  }
  0x14   :  { %s568_s19 = scalar_lea.hbm %s787_s1, 512 }
  0x15   :  { %p569_p8 = scmp.ne.s32.totalorder %s787_s1, %s568_s19  ;;  %p572_p9 = scmp.lt.u32.totalorder %s568_s19, %s787_s1 }
  0x17   :  { %p574_p10 = pnand %p572_p9, %p569_p8 }
  0x19   :  { %577 = shalt.err (!%p574_p10)
}
  0x1a   :  { %s578_s24 = scalar_lea.vmem %s689_s27, 512  ;;  %p583_p12 = scmp.lt.s32.totalorder %s689_s27, %s689_s27 }
  0x1b   :  { %p579_p11 = scmp.ne.s32.totalorder %s689_s27, %s578_s24  ;;  %p584_p13 = scmp.lt.s32.totalorder %s578_s24, %s578_s24 }
  0x1d   :  { %p585_p0 = por %p584_p13, %p583_p12 }
  0x1f   :  { %p586_p1 = pnand %p585_p0, %p579_p11 }
  0x21   :  { %589 = shalt.err (!%p586_p1)
}
  0x22   :  { %28 = dma.hbm_to_vmem [thread:$0]  %s787_s1, 512, %s689_s27, [#allocation3], %s642_s13, %s642_s13, %s643_s14  }
  0x23   :  { %s644_s26 = smov [#allocation7]   ;;  %s590_s8 = scalar_lea.hbm %s791_s5, 2048 }
  0x24   :  { %s50_s28 = sshll.u32 %s644_s26, 4  ;;  %p591_p2 = scmp.ne.s32.totalorder %s791_s5, %s590_s8  ;;  %s51_s28 = int_to_ptr.vmem [resolvable:$true] %s50_s28 }
  0x25   :  { %p594_p3 = scmp.lt.u32.totalorder %s590_s8, %s791_s5 }
  0x27   :  { %p596_p4 = pnand %p594_p3, %p591_p2 }
  0x29   :  { %599 = shalt.err (!%p596_p4)
}
  0x2a   :  { %s600_s15 = scalar_lea.vmem %s51_s28, 2048  ;;  %p605_p6 = scmp.lt.s32.totalorder %s51_s28, %s51_s28 }
  0x2b   :  { %p601_p5 = scmp.ne.s32.totalorder %s51_s28, %s600_s15  ;;  %p606_p7 = scmp.lt.s32.totalorder %s600_s15, %s600_s15 }
  0x2d   :  { %p607_p8 = por %p606_p7, %p605_p6 }
  0x2f   :  { %p608_p9 = pnand %p607_p8, %p601_p5 }
  0x31   :  { %611 = shalt.err (!%p608_p9)
}
  0x32   :  { %56 = dma.hbm_to_vmem [thread:$0]  %s791_s5, 2048, %s51_s28, [#allocation6], %s642_s13, %s642_s13, %s643_s14  }
  0x33   :  { %634 = dma.done.wait [#allocation3], 512  }
  0x34   :  { %635 = vsyncadd [#allocation3], 4294966784 }
  0x35   :  { %636 = dma.done.wait [#allocation6], 4096  }
  0x36   :  { %637 = vsyncadd [#allocation6], 4294963200  ;;  %v645_v0 = vmov 0.0|0.0   ;;  %vm646_vm0 = vmmov 0   ;;  %v647_v1 = vmov 0.0   ;;  %v69_v2 = vld [vmem:[#allocation2] sm:$0xff] }
  0x37   :  { %483 = vmatprep.subr.bf16.mxu0 %v645_v0  ;;  %410 = vmatprep.mubr.msk.f32.mxu0 %vm646_vm0, %v647_v1  ;;  %v70_v3 = vld [vmem:[#allocation2 + $0x8] sm:$0xff]  ;;  %v71_v4 = vld [vmem:[#allocation2 + $0x10] sm:$0xff]  ;;  %v72_v6 = vld [vmem:[#allocation2 + $0x18] sm:$0xff]  ;;  %vm80_vm1 = vcmask 261120   ;;  %s648_s19 = smov [#allocation8]  }
  0x38   :  { %489 = vmatprep.subr.bf16.mxu1 %v645_v0  ;;  %445 = vmatprep.mubr.msk.f32.mxu1 %vm646_vm0, %v647_v1  ;;  %v484_v5 = vpack.c.bf16 %v70_v3, %v69_v2  ;;  %v155_v7 = vld [vmem:[#allocation5] sm:$0xff]  ;;  %v156_v8 = vld [vmem:[#allocation5 + $0x8] sm:$0xff]  ;;  %v157_v9 = vld [vmem:[#allocation5 + $0x10] sm:$0xff]  ;;  %v487_v11 = vpack.c.bf16 %v72_v6, %v71_v4  ;;  %s349_s20 = sshll.u32 %s648_s19, 4  ;;  %s350_s20 = int_to_ptr.vmem [resolvable:$true] %s349_s20 }
  0x39   :  { %v158_v10 = vld [vmem:[#allocation5 + $0x18] sm:$0xff]  ;;  %v490_v12 = vpack.c.bf16 %v156_v8, %v155_v7  ;;  %v159_v14 = vld [vmem:[#allocation5 + $0x20] sm:$0xff]  ;;  %v160_v15 = vld [vmem:[#allocation5 + $0x28] sm:$0xff]  ;;  %s612_s21 = scalar_lea.vmem %s350_s20, 128  ;;  %p617_p11 = scmp.lt.s32.totalorder %s350_s20, %s350_s20 }
  0x3a   :  { %485 = vmatpush3.bf16.msra.mxu0 %v484_v5  ;;  %v493_v13 = vpack.c.bf16 %v158_v10, %v157_v9  ;;  %v68_v16 = vld [vmem:[%s786_s0] sm:$0xff]  ;;  %v496_v17 = vpack.c.bf16 %v160_v15, %v159_v14  ;;  %v161_v18 = vld [vmem:[#allocation5 + $0x30] sm:$0xff]  ;;  %v162_v19 = vld [vmem:[#allocation5 + $0x38] sm:$0xff]  ;;  %p613_p10 = scmp.ne.s32.totalorder %s350_s20, %s612_s21  ;;  %p618_p12 = scmp.lt.s32.totalorder %s612_s21, %s612_s21 }
  0x3b   :  { %486 = vmatprep.subr.bf16.mxu0 %v645_v0  ;;  %491 = vmatpush3.bf16.msra.mxu1 %v490_v12  ;;  %v499_v20 = vpack.c.bf16 %v162_v19, %v161_v18  ;;  %v163_v21 = vld [vmem:[#allocation5 + $0x40] sm:$0xff]  ;;  %v164_v22 = vld [vmem:[#allocation5 + $0x48] sm:$0xff]  ;;  %v165_v24 = vld [vmem:[#allocation5 + $0x50] sm:$0xff] }
  0x3c   :  { %492 = vmatprep.subr.bf16.mxu1 %v645_v0  ;;  %v502_v23 = vpack.c.bf16 %v164_v22, %v163_v21  ;;  %v166_v25 = vld [vmem:[#allocation5 + $0x58] sm:$0xff]  ;;  %v167_v27 = vld [vmem:[#allocation5 + $0x60] sm:$0xff]  ;;  %v168_v28 = vld [vmem:[#allocation5 + $0x68] sm:$0xff]  ;;  %p619_p13 = por %p618_p12, %p617_p11 }
  0x3d   :  { %v505_v26 = vpack.c.bf16 %v166_v25, %v165_v24  ;;  %v508_v29 = vpack.c.bf16 %v168_v28, %v167_v27  ;;  %v169_v30 = vld [vmem:[#allocation5 + $0x70] sm:$0xff]  ;;  %v170_v31 = vld [vmem:[#allocation5 + $0x78] sm:$0xff]  ;;  %v249_v33 = vld [vmem:[#allocation7] sm:$0xff] }
  0x3e   :  { %488 = vmatpush3.bf16.msra.mxu0 %v487_v11  ;;  %v511_v32 = vpack.c.bf16 %v170_v31, %v169_v30  ;;  %v250_v34 = vld [vmem:[#allocation7 + $0x8] sm:$0xff]  ;;  %v251_v35 = vld [vmem:[#allocation7 + $0x10] sm:$0xff]  ;;  %v252_v37 = vld [vmem:[#allocation7 + $0x18] sm:$0xff]  ;;  %p620_p0 = pnand %p619_p13, %p613_p10 }
  0x3f   :  { %513 = vmatprep.subr.bf16.mxu0 %v645_v0  ;;  %494 = vmatpush3.bf16.msra.mxu1 %v493_v13  ;;  %v514_v36 = vpack.c.bf16 %v250_v34, %v249_v33  ;;  %v517_v38 = vpack.c.bf16 %v252_v37, %v251_v35  ;;  %v253_v39 = vld [vmem:[#allocation7 + $0x20] sm:$0xff]  ;;  %v254_v40 = vld [vmem:[#allocation7 + $0x28] sm:$0xff]  ;;  %v255_v42 = vld [vmem:[#allocation7 + $0x30] sm:$0xff] }
  0x40   :  { %495 = vmatprep.subr.bf16.mxu1 %v645_v0  ;;  %v520_v41 = vpack.c.bf16 %v254_v40, %v253_v39  ;;  %v256_v43 = vld [vmem:[#allocation7 + $0x38] sm:$0xff]  ;;  %v257_v45 = vld [vmem:[#allocation7 + $0x40] sm:$0xff]  ;;  %v258_v46 = vld [vmem:[#allocation7 + $0x48] sm:$0xff] }
  0x41   :  { %411 = vmatmul.mubr.msk.f32.vlgmr.msra.gmra.mrb[0].mxu0 %vm80_vm1, %v68_v16  ;;  %v523_v44 = vpack.c.bf16 %v256_v43, %v255_v42  ;;  %v526_v47 = vpack.c.bf16 %v258_v46, %v257_v45  ;;  %v259_v48 = vld [vmem:[#allocation7 + $0x50] sm:$0xff]  ;;  %v260_v49 = vld [vmem:[#allocation7 + $0x58] sm:$0xff]  ;;  %v261_v51 = vld [vmem:[#allocation7 + $0x60] sm:$0xff] }
  0x42   :  { %480 = vmatprep.mubr.msk.f32.mxu0 %vm646_vm0, %v647_v1  ;;  %515 = vmatpush3.bf16.msra.mxu0 %v514_v36  ;;  %v529_v50 = vpack.c.bf16 %v260_v49, %v259_v48  ;;  %v262_v52 = vld [vmem:[#allocation7 + $0x68] sm:$0xff]  ;;  %v359_v54 = vld [vmem:[%s788_s2] ss:$0 sm:$0xff]  ;;  %v263_v59 = vld [vmem:[#allocation7 + $0x70] sm:$0xff] }
  0x43   :  { %497 = vmatpush3.bf16.msra.mxu1 %v496_v17  ;;  %516 = vmatprep.subr.bf16.mxu0 %v645_v0  ;;  %v532_v53 = vpack.c.bf16 %v262_v52, %v261_v51  ;;  %v264_v60 = vld [vmem:[#allocation7 + $0x78] sm:$0xff]  ;;  %v361_v62 = vld [vmem:[%s790_s4] ss:$0 sm:$0xff] }
  0x44   :  { %498 = vmatprep.subr.bf16.mxu1 %v645_v0  ;;  %v535_v61 = vpack.c.bf16 %v264_v60, %v263_v59  ;;  %v362_v3 = vld [vmem:[%s792_s6] ss:$0 sm:$0xff] }
  0x46   :  { %518 = vmatpush3.bf16.msra.mxu0 %v517_v38 }
  0x47   :  { %500 = vmatpush3.bf16.msra.mxu1 %v499_v20  ;;  %519 = vmatprep.subr.bf16.mxu0 %v645_v0 }
  0x48   :  { %501 = vmatprep.subr.bf16.mxu1 %v645_v0 }
  0x4a   :  { %521 = vmatpush3.bf16.msra.mxu0 %v520_v41 }
  0x4b   :  { %503 = vmatpush3.bf16.msra.mxu1 %v502_v23  ;;  %522 = vmatprep.subr.bf16.mxu0 %v645_v0 }
  0x4c   :  { %504 = vmatprep.subr.bf16.mxu1 %v645_v0 }
  0x4e   :  { %524 = vmatpush3.bf16.msra.mxu0 %v523_v44 }
  0x4f   :  { %506 = vmatpush3.bf16.msra.mxu1 %v505_v26  ;;  %525 = vmatprep.subr.bf16.mxu0 %v645_v0 }
  0x50   :  { %507 = vmatprep.subr.bf16.mxu1 %v645_v0 }
  0x52   :  { %527 = vmatpush3.bf16.msra.mxu0 %v526_v47 }
  0x53   :  { %509 = vmatpush3.bf16.msra.mxu1 %v508_v29  ;;  %528 = vmatprep.subr.bf16.mxu0 %v645_v0 }
  0x54   :  { %510 = vmatprep.subr.bf16.mxu1 %v645_v0 }
  0x56   :  { %530 = vmatpush3.bf16.msra.mxu0 %v529_v50 }
  0x57   :  { %512 = vmatpush3.bf16.msra.mxu1 %v511_v32  ;;  %531 = vmatprep.subr.bf16.mxu0 %v645_v0 }
  0x5a   :  { %533 = vmatpush3.bf16.msra.mxu0 %v532_v53 }
  0x5b   :  { %534 = vmatprep.subr.bf16.mxu0 %v645_v0 }
  0x5e   :  { %536 = vmatpush3.bf16.msra.mxu0 %v535_v61 }
 0x114   :  { %v150_v55 = vpop.f32.mrb[0].mxu0 }
 0x115   :  { %v151_v56 = vadd.f32 %v359_v54, %v150_v55  ;;  %v412_v57 = vpop.f32.mrb[1].mxu0 }
 0x117   :  { %v154_v58 = vmax.f32 %v151_v56, 0.0 }
 0x119   :  { %446 = vmatmul.mubr.f32.vlgmr.msra.gmra.mrb[0].mxu1 %v154_v58 }
 0x1ec   :  { %v244_v63 = vpop.f32.mrb[0].mxu1 }
 0x1ed   :  { %v245_v1 = vadd.f32 %v361_v62, %v244_v63  ;;  %v447_v0 = vpop.f32.mrb[1].mxu1 }
 0x1ef   :  { %v248_v2 = vmax.f32 %v245_v1, 0.0 }
 0x1f1   :  { %481 = vmatmul.mubr.f32.vlgmr.msra.gmra.mrb[2].mxu0 %v248_v2 }
 0x2c4   :  { %v338_v4 = vpop.f32.mrb[2].mxu0 }
 0x2c5   :  { %v339_v5 = vadd.f32 %v362_v3, %v338_v4  ;;  %v482_v6 = vpop.f32.mrb[3].mxu0 }
 0x2c7   :  { %342 = vst [vmem:[#allocation8] sm:$0xff] %v339_v5 }
 0x2c8   :  { %623 = shalt.err (!%p620_p0)
}
 0x2c9   :  { %s624_s23 = scalar_lea.hbm %s793_s7, 128 }
 0x2ca   :  { %p625_p1 = scmp.ne.s32.totalorder %s793_s7, %s624_s23  ;;  %p628_p2 = scmp.lt.u32.totalorder %s624_s23, %s793_s7 }
 0x2cc   :  { %p630_p3 = pnand %p628_p2, %p625_p1 }
 0x2ce   :  { %633 = shalt.err (!%p630_p3)
}
 0x2cf   :  { %352 = dma.vmem_to_hbm [thread:$0]  %s350_s20, 128, %s793_s7, [#allocation4]  }
 0x2d0   :  { %638 = dma.done.wait [#allocation4], 128  }
 0x2d1   :  { %639 = vsyncadd [#allocation4], 4294967168 }
 0x2d2   :  { %356 = vsyncpa [#allocation3], 1 }
 0x2d3   :  { %357 = vsyncpa [#allocation6], 1 }
 0x2d4   :  { %358 = vsyncpa [#allocation4], 1 }

// kernel: emotion_classifier_forward.1
= control target key start
LH: loop header
LB: loop body
LE: loop exit
PB: predicated region body
PF: predicated region fallthrough
CT: control target
= control target key end

     0   :  { %12 = vsyncpa [#allocation3], 0  ;;  %s786_s0 = inlined_call_operand.vmem [shape: f32[8,32], index: 0, kind: input, shape index: {}]   ;;  %s787_s1 = inlined_call_operand.hbm [shape: f32[32,128], index: 1, kind: input, shape index: {}]   ;;  %s788_s2 = inlined_call_operand.vmem [shape: f32[1,128], index: 2, kind: input, shape index: {}]   ;;  %s789_s3 = inlined_call_operand.hbm [shape: f32[128,128], index: 3, kind: input, shape index: {}]   ;;  %s790_s4 = inlined_call_operand.vmem [shape: f32[1,128], index: 4, kind: input, shape index: {}]   ;;  %s791_s5 = inlined_call_operand.hbm [shape: f32[128,128], index: 5, kind: input, shape index: {}]   ;;  %s792_s6 = inlined_call_operand.vmem [shape: f32[1,128], index: 6, kind: input, shape index: {}]   ;;  %s793_s7 = inlined_call_operand.hbm [shape: f32[8,128], index: 7, kind: output, shape index: {}]  }
   0x1   :  { %13 = vsyncpa [#allocation6], 0 }
   0x2   :  { %14 = vsyncpa [#allocation4], 0  ;;  %s640_s24 = smov [#allocation5]   ;;  %s641_s26 = smov [#allocation2]  }
   0x3   :  { %s36_s25 = sshll.u32 %s640_s24, 4  ;;  %s22_s27 = sshll.u32 %s641_s26, 4  ;;  %s37_s25 = int_to_ptr.vmem [resolvable:$true] %s36_s25  ;;  %s689_s27 = int_to_ptr.vmem [resolvable:$true] %s22_s27 }
   0x4   :  { %s546_s30 = scalar_lea.hbm %s789_s3, 2048 }
   0x5   :  { %p547_p0 = scmp.ne.s32.totalorder %s789_s3, %s546_s30  ;;  %p550_p1 = scmp.lt.u32.totalorder %s546_s30, %s789_s3 }
   0x7   :  { %p552_p2 = pnand %p550_p1, %p547_p0 }
   0x9   :  { %555 = shalt.err (!%p552_p2)
}
   0xa   :  { %s556_s12 = scalar_lea.vmem %s37_s25, 2048  ;;  %p561_p4 = scmp.lt.s32.totalorder %s37_s25, %s37_s25 }
   0xb   :  { %p557_p3 = scmp.ne.s32.totalorder %s37_s25, %s556_s12  ;;  %p562_p5 = scmp.lt.s32.totalorder %s556_s12, %s556_s12 }
   0xd   :  { %p563_p6 = por %p562_p5, %p561_p4 }
   0xf   :  { %p564_p7 = pnand %p563_p6, %p557_p3 }
  0x11   :  { %567 = shalt.err (!%p564_p7)
}
  0x12   :  { %s642_s13 = smov 128   ;;  %s643_s14 = smov 8  }
  0x13   :  { %42 = dma.hbm_to_vmem [thread:$0]  %s789_s3, 2048, %s37_s25, [#allocation6], %s642_s13, %s642_s13, %s643_s14  }
  0x14   :  { %s568_s19 = scalar_lea.hbm %s787_s1, 512 }
  0x15   :  { %p569_p8 = scmp.ne.s32.totalorder %s787_s1, %s568_s19  ;;  %p572_p9 = scmp.lt.u32.totalorder %s568_s19, %s787_s1 }
  0x17   :  { %p574_p10 = pnand %p572_p9, %p569_p8 }
  0x19   :  { %577 = shalt.err (!%p574_p10)
}
  0x1a   :  { %s578_s24 = scalar_lea.vmem %s689_s27, 512  ;;  %p583_p12 = scmp.lt.s32.totalorder %s689_s27, %s689_s27 }
  0x1b   :  { %p579_p11 = scmp.ne.s32.totalorder %s689_s27, %s578_s24  ;;  %p584_p13 = scmp.lt.s32.totalorder %s578_s24, %s578_s24 }
  0x1d   :  { %p585_p0 = por %p584_p13, %p583_p12 }
  0x1f   :  { %p586_p1 = pnand %p585_p0, %p579_p11 }
  0x21   :  { %589 = shalt.err (!%p586_p1)
}
  0x22   :  { %28 = dma.hbm_to_vmem [thread:$0]  %s787_s1, 512, %s689_s27, [#allocation3], %s642_s13, %s642_s13, %s643_s14  }
  0x23   :  { %s644_s26 = smov [#allocation7]   ;;  %s590_s8 = scalar_lea.hbm %s791_s5, 2048 }
  0x24   :  { %s50_s28 = sshll.u32 %s644_s26, 4  ;;  %p591_p2 = scmp.ne.s32.totalorder %s791_s5, %s590_s8  ;;  %s51_s28 = int_to_ptr.vmem [resolvable:$true] %s50_s28 }
  0x25   :  { %p594_p3 = scmp.lt.u32.totalorder %s590_s8, %s791_s5 }
  0x27   :  { %p596_p4 = pnand %p594_p3, %p591_p2 }
  0x29   :  { %599 = shalt.err (!%p596_p4)
}
  0x2a   :  { %s600_s15 = scalar_lea.vmem %s51_s28, 2048  ;;  %p605_p6 = scmp.lt.s32.totalorder %s51_s28, %s51_s28 }
  0x2b   :  { %p601_p5 = scmp.ne.s32.totalorder %s51_s28, %s600_s15  ;;  %p606_p7 = scmp.lt.s32.totalorder %s600_s15, %s600_s15 }
  0x2d   :  { %p607_p8 = por %p606_p7, %p605_p6 }
  0x2f   :  { %p608_p9 = pnand %p607_p8, %p601_p5 }
  0x31   :  { %611 = shalt.err (!%p608_p9)
}
  0x32   :  { %56 = dma.hbm_to_vmem [thread:$0]  %s791_s5, 2048, %s51_s28, [#allocation6], %s642_s13, %s642_s13, %s643_s14  }
  0x33   :  { %634 = dma.done.wait [#allocation3], 512  }
  0x34   :  { %635 = vsyncadd [#allocation3], 4294966784 }
  0x35   :  { %636 = dma.done.wait [#allocation6], 4096  }
  0x36   :  { %637 = vsyncadd [#allocation6], 4294963200  ;;  %v645_v0 = vmov 0.0|0.0   ;;  %vm646_vm0 = vmmov 0   ;;  %v647_v1 = vmov 0.0   ;;  %v69_v2 = vld [vmem:[#allocation2] sm:$0xff] }
  0x37   :  { %483 = vmatprep.subr.bf16.mxu0 %v645_v0  ;;  %410 = vmatprep.mubr.msk.f32.mxu0 %vm646_vm0, %v647_v1  ;;  %v70_v3 = vld [vmem:[#allocation2 + $0x8] sm:$0xff]  ;;  %v71_v4 = vld [vmem:[#allocation2 + $0x10] sm:$0xff]  ;;  %v72_v6 = vld [vmem:[#allocation2 + $0x18] sm:$0xff]  ;;  %vm80_vm1 = vcmask 261120   ;;  %s648_s19 = smov [#allocation8]  }
  0x38   :  { %489 = vmatprep.subr.bf16.mxu1 %v645_v0  ;;  %445 = vmatprep.mubr.msk.f32.mxu1 %vm646_vm0, %v647_v1  ;;  %v484_v5 = vpack.c.bf16 %v70_v3, %v69_v2  ;;  %v155_v7 = vld [vmem:[#allocation5] sm:$0xff]  ;;  %v156_v8 = vld [vmem:[#allocation5 + $0x8] sm:$0xff]  ;;  %v157_v9 = vld [vmem:[#allocation5 + $0x10] sm:$0xff]  ;;  %v487_v11 = vpack.c.bf16 %v72_v6, %v71_v4  ;;  %s349_s20 = sshll.u32 %s648_s19, 4  ;;  %s350_s20 = int_to_ptr.vmem [resolvable:$true] %s349_s20 }
  0x39   :  { %v158_v10 = vld [vmem:[#allocation5 + $0x18] sm:$0xff]  ;;  %v490_v12 = vpack.c.bf16 %v156_v8, %v155_v7  ;;  %v159_v14 = vld [vmem:[#allocation5 + $0x20] sm:$0xff]  ;;  %v160_v15 = vld [vmem:[#allocation5 + $0x28] sm:$0xff]  ;;  %s612_s21 = scalar_lea.vmem %s350_s20, 128  ;;  %p617_p11 = scmp.lt.s32.totalorder %s350_s20, %s350_s20 }
  0x3a   :  { %485 = vmatpush3.bf16.msra.mxu0 %v484_v5  ;;  %v493_v13 = vpack.c.bf16 %v158_v10, %v157_v9  ;;  %v68_v16 = vld [vmem:[%s786_s0] sm:$0xff]  ;;  %v496_v17 = vpack.c.bf16 %v160_v15, %v159_v14  ;;  %v161_v18 = vld [vmem:[#allocation5 + $0x30] sm:$0xff]  ;;  %v162_v19 = vld [vmem:[#allocation5 + $0x38] sm:$0xff]  ;;  %p613_p10 = scmp.ne.s32.totalorder %s350_s20, %s612_s21  ;;  %p618_p12 = scmp.lt.s32.totalorder %s612_s21, %s612_s21 }
  0x3b   :  { %486 = vmatprep.subr.bf16.mxu0 %v645_v0  ;;  %491 = vmatpush3.bf16.msra.mxu1 %v490_v12  ;;  %v499_v20 = vpack.c.bf16 %v162_v19, %v161_v18  ;;  %v163_v21 = vld [vmem:[#allocation5 + $0x40] sm:$0xff]  ;;  %v164_v22 = vld [vmem:[#allocation5 + $0x48] sm:$0xff]  ;;  %v165_v24 = vld [vmem:[#allocation5 + $0x50] sm:$0xff] }
  0x3c   :  { %492 = vmatprep.subr.bf16.mxu1 %v645_v0  ;;  %v502_v23 = vpack.c.bf16 %v164_v22, %v163_v21  ;;  %v166_v25 = vld [vmem:[#allocation5 + $0x58] sm:$0xff]  ;;  %v167_v27 = vld [vmem:[#allocation5 + $0x60] sm:$0xff]  ;;  %v168_v28 = vld [vmem:[#allocation5 + $0x68] sm:$0xff]  ;;  %p619_p13 = por %p618_p12, %p617_p11 }
  0x3d   :  { %v505_v26 = vpack.c.bf16 %v166_v25, %v165_v24  ;;  %v508_v29 = vpack.c.bf16 %v168_v28, %v167_v27  ;;  %v169_v30 = vld [vmem:[#allocation5 + $0x70] sm:$0xff]  ;;  %v170_v31 = vld [vmem:[#allocation5 + $0x78] sm:$0xff]  ;;  %v249_v33 = vld [vmem:[#allocation7] sm:$0xff] }
  0x3e   :  { %488 = vmatpush3.bf16.msra.mxu0 %v487_v11  ;;  %v511_v32 = vpack.c.bf16 %v170_v31, %v169_v30  ;;  %v250_v34 = vld [vmem:[#allocation7 + $0x8] sm:$0xff]  ;;  %v251_v35 = vld [vmem:[#allocation7 + $0x10] sm:$0xff]  ;;  %v252_v37 = vld [vmem:[#allocation7 + $0x18] sm:$0xff]  ;;  %p620_p0 = pnand %p619_p13, %p613_p10 }
  0x3f   :  { %513 = vmatprep.subr.bf16.mxu0 %v645_v0  ;;  %494 = vmatpush3.bf16.msra.mxu1 %v493_v13  ;;  %v514_v36 = vpack.c.bf16 %v250_v34, %v249_v33  ;;  %v517_v38 = vpack.c.bf16 %v252_v37, %v251_v35  ;;  %v253_v39 = vld [vmem:[#allocation7 + $0x20] sm:$0xff]  ;;  %v254_v40 = vld [vmem:[#allocation7 + $0x28] sm:$0xff]  ;;  %v255_v42 = vld [vmem:[#allocation7 + $0x30] sm:$0xff] }
  0x40   :  { %495 = vmatprep.subr.bf16.mxu1 %v645_v0  ;;  %v520_v41 = vpack.c.bf16 %v254_v40, %v253_v39  ;;  %v256_v43 = vld [vmem:[#allocation7 + $0x38] sm:$0xff]  ;;  %v257_v45 = vld [vmem:[#allocation7 + $0x40] sm:$0xff]  ;;  %v258_v46 = vld [vmem:[#allocation7 + $0x48] sm:$0xff] }
  0x41   :  { %411 = vmatmul.mubr.msk.f32.vlgmr.msra.gmra.mrb[0].mxu0 %vm80_vm1, %v68_v16  ;;  %v523_v44 = vpack.c.bf16 %v256_v43, %v255_v42  ;;  %v526_v47 = vpack.c.bf16 %v258_v46, %v257_v45  ;;  %v259_v48 = vld [vmem:[#allocation7 + $0x50] sm:$0xff]  ;;  %v260_v49 = vld [vmem:[#allocation7 + $0x58] sm:$0xff]  ;;  %v261_v51 = vld [vmem:[#allocation7 + $0x60] sm:$0xff] }
  0x42   :  { %480 = vmatprep.mubr.msk.f32.mxu0 %vm646_vm0, %v647_v1  ;;  %515 = vmatpush3.bf16.msra.mxu0 %v514_v36  ;;  %v529_v50 = vpack.c.bf16 %v260_v49, %v259_v48  ;;  %v262_v52 = vld [vmem:[#allocation7 + $0x68] sm:$0xff]  ;;  %v359_v54 = vld [vmem:[%s788_s2] ss:$0 sm:$0xff]  ;;  %v263_v59 = vld [vmem:[#allocation7 + $0x70] sm:$0xff] }
  0x43   :  { %497 = vmatpush3.bf16.msra.mxu1 %v496_v17  ;;  %516 = vmatprep.subr.bf16.mxu0 %v645_v0  ;;  %v532_v53 = vpack.c.bf16 %v262_v52, %v261_v51  ;;  %v264_v60 = vld [vmem:[#allocation7 + $0x78] sm:$0xff]  ;;  %v361_v62 = vld [vmem:[%s790_s4] ss:$0 sm:$0xff] }
  0x44   :  { %498 = vmatprep.subr.bf16.mxu1 %v645_v0  ;;  %v535_v61 = vpack.c.bf16 %v264_v60, %v263_v59  ;;  %v362_v3 = vld [vmem:[%s792_s6] ss:$0 sm:$0xff] }
  0x46   :  { %518 = vmatpush3.bf16.msra.mxu0 %v517_v38 }
  0x47   :  { %500 = vmatpush3.bf16.msra.mxu1 %v499_v20  ;;  %519 = vmatprep.subr.bf16.mxu0 %v645_v0 }
  0x48   :  { %501 = vmatprep.subr.bf16.mxu1 %v645_v0 }
  0x4a   :  { %521 = vmatpush3.bf16.msra.mxu0 %v520_v41 }
  0x4b   :  { %503 = vmatpush3.bf16.msra.mxu1 %v502_v23  ;;  %522 = vmatprep.subr.bf16.mxu0 %v645_v0 }
  0x4c   :  { %504 = vmatprep.subr.bf16.mxu1 %v645_v0 }
  0x4e   :  { %524 = vmatpush3.bf16.msra.mxu0 %v523_v44 }
  0x4f   :  { %506 = vmatpush3.bf16.msra.mxu1 %v505_v26  ;;  %525 = vmatprep.subr.bf16.mxu0 %v645_v0 }
  0x50   :  { %507 = vmatprep.subr.bf16.mxu1 %v645_v0 }
  0x52   :  { %527 = vmatpush3.bf16.msra.mxu0 %v526_v47 }
  0x53   :  { %509 = vmatpush3.bf16.msra.mxu1 %v508_v29  ;;  %528 = vmatprep.subr.bf16.mxu0 %v645_v0 }
  0x54   :  { %510 = vmatprep.subr.bf16.mxu1 %v645_v0 }
  0x56   :  { %530 = vmatpush3.bf16.msra.mxu0 %v529_v50 }
  0x57   :  { %512 = vmatpush3.bf16.msra.mxu1 %v511_v32  ;;  %531 = vmatprep.subr.bf16.mxu0 %v645_v0 }
  0x5a   :  { %533 = vmatpush3.bf16.msra.mxu0 %v532_v53 }
  0x5b   :  { %534 = vmatprep.subr.bf16.mxu0 %v645_v0 }
  0x5e   :  { %536 = vmatpush3.bf16.msra.mxu0 %v535_v61 }
 0x114   :  { %v150_v55 = vpop.f32.mrb[0].mxu0 }
 0x115   :  { %v151_v56 = vadd.f32 %v359_v54, %v150_v55  ;;  %v412_v57 = vpop.f32.mrb[1].mxu0 }
 0x117   :  { %v154_v58 = vmax.f32 %v151_v56, 0.0 }
 0x119   :  { %446 = vmatmul.mubr.f32.vlgmr.msra.gmra.mrb[0].mxu1 %v154_v58 }
 0x1ec   :  { %v244_v63 = vpop.f32.mrb[0].mxu1 }
 0x1ed   :  { %v245_v1 = vadd.f32 %v361_v62, %v244_v63  ;;  %v447_v0 = vpop.f32.mrb[1].mxu1 }
 0x1ef   :  { %v248_v2 = vmax.f32 %v245_v1, 0.0 }
 0x1f1   :  { %481 = vmatmul.mubr.f32.vlgmr.msra.gmra.mrb[2].mxu0 %v248_v2 }
 0x2c4   :  { %v338_v4 = vpop.f32.mrb[2].mxu0 }
 0x2c5   :  { %v339_v5 = vadd.f32 %v362_v3, %v338_v4  ;;  %v482_v6 = vpop.f32.mrb[3].mxu0 }
 0x2c7   :  { %342 = vst [vmem:[#allocation8] sm:$0xff] %v339_v5 }
 0x2c8   :  { %623 = shalt.err (!%p620_p0)
}
 0x2c9   :  { %s624_s23 = scalar_lea.hbm %s793_s7, 128 }
 0x2ca   :  { %p625_p1 = scmp.ne.s32.totalorder %s793_s7, %s624_s23  ;;  %p628_p2 = scmp.lt.u32.totalorder %s624_s23, %s793_s7 }
 0x2cc   :  { %p630_p3 = pnand %p628_p2, %p625_p1 }
 0x2ce   :  { %633 = shalt.err (!%p630_p3)
}
 0x2cf   :  { %352 = dma.vmem_to_hbm [thread:$0]  %s350_s20, 128, %s793_s7, [#allocation4]  }
 0x2d0   :  { %638 = dma.done.wait [#allocation4], 128  }
 0x2d1   :  { %639 = vsyncadd [#allocation4], 4294967168 }
 0x2d2   :  { %356 = vsyncpa [#allocation3], 1 }
 0x2d3   :  { %357 = vsyncpa [#allocation6], 1 }
 0x2d4   :  { %358 = vsyncpa [#allocation4], 1 }

</bundles_post_ra>
